<compile_context>
chip_gen: v7x
topology: tpu7x:2x2x1
jax: 0.10.0
libtpu: 0.0.40
codegen_flags: <defaults>
</compile_context>

<pallas_src>
from math import sqrt

import jax
import jax.numpy as jnp
from jax.experimental import pallas as pl
from jax.experimental.pallas import tpu as pltpu

DIMS = [32, 64, 32, 32, 16]   # small dims consistent with the module's [784,256,64,64,62]
START_NORM = sqrt(3)


def _round_up(n, m):
    return ((n + m - 1) // m) * m


def _mlp_kernel(x_ref, w0, b0, w1, b1, w2, b2, w3, b3, outnorms_ref, o_ref):
    h = x_ref[...]                                             # f32 activations
    for w_ref, b_ref in ((w0, b0), (w1, b1), (w2, b2), (w3, b3)):
        # MXU matmul (optionally bf16 inputs), f32 accumulate.
        h = jnp.dot(h.astype(w_ref.dtype), w_ref[...],
                    preferred_element_type=jnp.float32)
        h = jnp.maximum(h + b_ref[...], 0.0)                   # bias + ReLU in f32 (VPU)
    # Lane-dense store: d_out is padded to a multiple of 128 in the wrapper.
    o_ref[...] = (outnorms_ref[...] * h).astype(o_ref.dtype)


def mlp_normed_alt_forward(x, weights, biases, outnorms, *,
                           block_b=512, mxu_dtype=jnp.float32,
                           vmem_limit_bytes=None):
    """Forward pass of MLP_normed_alt.

    x:        (B, dims[0]) float32
    weights:  list of (d_out, d_in) float32 (PyTorch nn.Linear layout)
    biases:   list of (d_out,) float32
    outnorms: (dims[-1],) float32
    """
    B, d_in = x.shape
    d_out = weights[-1].shape[0]

    # ---- parameter prep (glue): transpose to (d_in, d_out); zero-pad the
    # ---- final layer's output dim to a multiple of 128 (lane-dense store).
    d_out_pad = _round_up(d_out, 128)
    weights_t = [w.T.astype(mxu_dtype) for w in weights]
    biases_2d = [b.reshape(1, -1).astype(jnp.float32) for b in biases]
    weights_t[-1] = jnp.pad(weights_t[-1], ((0, 0), (0, d_out_pad - d_out)))
    biases_2d[-1] = jnp.pad(biases_2d[-1], ((0, 0), (0, d_out_pad - d_out)))
    outnorms_2d = jnp.pad(outnorms.reshape(1, -1).astype(jnp.float32),
                          ((0, 0), (0, d_out_pad - d_out)))

    # ---- batch tiling: large tiles, pad B so no divisibility assert is needed.
    block_b = _round_up(max(8, min(block_b, _round_up(B, 8))), 8)
    B_pad = _round_up(B, block_b)
    if B_pad != B:
        x = jnp.pad(x, ((0, B_pad - B), (0, 0)))
    grid = (B_pad // block_b,)

    in_specs = [pl.BlockSpec((block_b, d_in), lambda i: (i, 0))]
    args = [x]
    for w_t, b in zip(weights_t, biases_2d):
        # Constant index_map -> block index never changes across the grid, so
        # the weights/biases stay VMEM-resident (no per-step re-DMA).
        in_specs.append(pl.BlockSpec(w_t.shape, lambda i: (0, 0)))
        in_specs.append(pl.BlockSpec(b.shape, lambda i: (0, 0)))
        args.append(w_t)
        args.append(b)
    in_specs.append(pl.BlockSpec(outnorms_2d.shape, lambda i: (0, 0)))
    args.append(outnorms_2d)

    out = pl.pallas_call(
        _mlp_kernel,
        out_shape=jax.ShapeDtypeStruct((B_pad, d_out_pad), jnp.float32),
        grid=grid,
        in_specs=in_specs,
        out_specs=pl.BlockSpec((block_b, d_out_pad), lambda i: (i, 0)),
        compiler_params=pltpu.CompilerParams(
            dimension_semantics=("parallel",),        # megacore split on v7x
            vmem_limit_bytes=vmem_limit_bytes,        # set at real dims / huge block_b
        ),
    )(*args)
    return out[:B, :d_out]


def init_params(key, dims, start_norm=START_NORM, outnorm_init=1.0):
    """nn.Linear-style init followed by MLP_normed_alt.normalize(start_norm, bubble=True)."""
    weights, biases = [], []
    for i in range(len(dims) - 1):
        d_in, d_out = dims[i], dims[i + 1]
        key, kw, kb = jax.random.split(key, 3)
        bound = 1.0 / sqrt(d_in)
        weights.append(jax.random.uniform(kw, (d_out, d_in), jnp.float32, -bound, bound))
        biases.append(jax.random.uniform(kb, (d_out,), jnp.float32, -bound, bound))
    outnorms = outnorm_init * jnp.ones((dims[-1],), jnp.float32)

    # bubble normalization at construction time
    old_norms = None
    for i in range(len(weights)):
        w, b = weights[i], biases[i]
        if old_norms is not None:
            w = w * old_norms.T                     # (1, prev_out) broadcast over input axis
        normlist = (1.0 / start_norm) * jnp.linalg.norm(w, axis=-1, keepdims=True) + 1e-10
        w = w / normlist
        b = b / normlist[:, 0]
        weights[i], biases[i] = w, b
        old_norms = normlist
    outnorms = outnorms * old_norms[:, 0]
    return weights, biases, outnorms


def _ref_forward(x, weights, biases, outnorms):
    h = x
    for w, b in zip(weights, biases):
        h = jnp.maximum(h @ w.T + b, 0.0)
    return outnorms * h


if __name__ == "__main__":
    key = jax.random.PRNGKey(0)
    k_params, k_x, k_x2 = jax.random.split(key, 3)

    weights, biases, outnorms = init_params(k_params, DIMS)

    # ---- case 1: small batch, single grid step, f32 MXU (exact) ----
    B = 16
    x = jax.random.normal(k_x, (B, DIMS[0]), jnp.float32)
    ref = _ref_forward(x, weights, biases, outnorms)

    out = mlp_normed_alt_forward(x, weights, biases, outnorms, block_b=512)
    out = jax.block_until_ready(out)
    assert out.shape == (B, DIMS[-1])
    assert jnp.allclose(out, ref, atol=1e-5, rtol=1e-5), "f32 kernel mismatch vs JAX reference"

    # ---- case 2: batch not divisible by the tile (pad + multi-step grid) ----
    B2 = 40
    x2 = jax.random.normal(k_x2, (B2, DIMS[0]), jnp.float32)
    ref2 = _ref_forward(x2, weights, biases, outnorms)
    out2 = mlp_normed_alt_forward(x2, weights, biases, outnorms, block_b=16)
    out2 = jax.block_until_ready(out2)
    assert out2.shape == (B2, DIMS[-1])
    assert jnp.allclose(out2, ref2, atol=1e-5, rtol=1e-5), "tail-padded kernel mismatch"

    # ---- case 3: bf16-at-the-MXU path (v6e/v7x win; f32 accumulate & VPU ops) ----
    out_bf16 = mlp_normed_alt_forward(x, weights, biases, outnorms,
                                      block_b=512, mxu_dtype=jnp.bfloat16)
    out_bf16 = jax.block_until_ready(out_bf16)
    assert jnp.allclose(out_bf16, ref, atol=5e-2, rtol=5e-2), "bf16 kernel mismatch (loose tol)"

    print("KERNEL_OK")
</pallas_src>

<mosaic_0001>
module attributes {stable_mosaic.version = 11 : i64} {
  func.func @_mlp_kernel(%arg0: i32, %arg1: memref<16x32xf32, #tpu.memory_space<vmem>>, %arg2: memref<32x64xf32, #tpu.memory_space<vmem>>, %arg3: memref<1x64xf32, #tpu.memory_space<vmem>>, %arg4: memref<64x32xf32, #tpu.memory_space<vmem>>, %arg5: memref<1x32xf32, #tpu.memory_space<vmem>>, %arg6: memref<32x32xf32, #tpu.memory_space<vmem>>, %arg7: memref<1x32xf32, #tpu.memory_space<vmem>>, %arg8: memref<32x128xf32, #tpu.memory_space<vmem>>, %arg9: memref<1x128xf32, #tpu.memory_space<vmem>>, %arg10: memref<1x128xf32, #tpu.memory_space<vmem>>, %arg11: memref<16x128xf32, #tpu.memory_space<vmem>>) attributes {dimension_semantics = [#tpu.dimension_semantics<parallel>], iteration_bounds = array<i64: 1>, scalar_prefetch = 0 : i64, scratch_operands = 0 : i64, tpu.core_type = #tpu.core_type<tc>, window_params = [{transform_indices = @transform_0, window_bounds = array<i64: 16, 32>}, {pipeline_mode = #tpu.pipeline_mode<synchronous>, transform_indices = @transform_1, window_bounds = array<i64: 32, 64>}, {pipeline_mode = #tpu.pipeline_mode<synchronous>, transform_indices = @transform_2, window_bounds = array<i64: 1, 64>}, {pipeline_mode = #tpu.pipeline_mode<synchronous>, transform_indices = @transform_3, window_bounds = array<i64: 64, 32>}, {pipeline_mode = #tpu.pipeline_mode<synchronous>, transform_indices = @transform_4, window_bounds = array<i64: 1, 32>}, {pipeline_mode = #tpu.pipeline_mode<synchronous>, transform_indices = @transform_5, window_bounds = array<i64: 32, 32>}, {pipeline_mode = #tpu.pipeline_mode<synchronous>, transform_indices = @transform_6, window_bounds = array<i64: 1, 32>}, {pipeline_mode = #tpu.pipeline_mode<synchronous>, transform_indices = @transform_7, window_bounds = array<i64: 32, 128>}, {pipeline_mode = #tpu.pipeline_mode<synchronous>, transform_indices = @transform_8, window_bounds = array<i64: 1, 128>}, {pipeline_mode = #tpu.pipeline_mode<synchronous>, transform_indices = @transform_9, window_bounds = array<i64: 1, 128>}, {transform_indices = @transform_10, window_bounds = array<i64: 16, 128>}]} {
    %c0 = arith.constant 0 : index
    %c0_0 = arith.constant 0 : index
    %0 = vector.load %arg1[%c0, %c0_0] : memref<16x32xf32, #tpu.memory_space<vmem>>, vector<16x32xf32>
    %c0_1 = arith.constant 0 : index
    %c0_2 = arith.constant 0 : index
    %1 = vector.load %arg2[%c0_1, %c0_2] : memref<32x64xf32, #tpu.memory_space<vmem>>, vector<32x64xf32>
    %cst = arith.constant dense<0.000000e+00> : vector<16x64xf32>
    %2 = tpu.matmul %0, %1, %cst {dimension_numbers = #tpu.dot_dimension_numbers<[1], [0], [0], [1], [0, 0, 1, 1], [], []>} : vector<16x32xf32>, vector<32x64xf32>, vector<16x64xf32> -> vector<16x64xf32>
    %c0_3 = arith.constant 0 : index
    %c0_4 = arith.constant 0 : index
    %3 = vector.load %arg3[%c0_3, %c0_4] : memref<1x64xf32, #tpu.memory_space<vmem>>, vector<1x64xf32>
    %4 = vector.broadcast %3 : vector<1x64xf32> to vector<16x64xf32>
    %5 = arith.addf %2, %4 : vector<16x64xf32>
    %cst_5 = arith.constant 0.000000e+00 : f32
    %6 = vector.broadcast %cst_5 : f32 to vector<16x64xf32>
    %7 = arith.maximumf %5, %6 : vector<16x64xf32>
    %c0_6 = arith.constant 0 : index
    %c0_7 = arith.constant 0 : index
    %8 = vector.load %arg4[%c0_6, %c0_7] : memref<64x32xf32, #tpu.memory_space<vmem>>, vector<64x32xf32>
    %cst_8 = arith.constant dense<0.000000e+00> : vector<16x32xf32>
    %9 = tpu.matmul %7, %8, %cst_8 {dimension_numbers = #tpu.dot_dimension_numbers<[1], [0], [0], [1], [0, 0, 1, 1], [], []>} : vector<16x64xf32>, vector<64x32xf32>, vector<16x32xf32> -> vector<16x32xf32>
    %c0_9 = arith.constant 0 : index
    %c0_10 = arith.constant 0 : index
    %10 = vector.load %arg5[%c0_9, %c0_10] : memref<1x32xf32, #tpu.memory_space<vmem>>, vector<1x32xf32>
    %11 = vector.broadcast %10 : vector<1x32xf32> to vector<16x32xf32>
    %12 = arith.addf %9, %11 : vector<16x32xf32>
    %cst_11 = arith.constant 0.000000e+00 : f32
    %13 = vector.broadcast %cst_11 : f32 to vector<16x32xf32>
    %14 = arith.maximumf %12, %13 : vector<16x32xf32>
    %c0_12 = arith.constant 0 : index
    %c0_13 = arith.constant 0 : index
    %15 = vector.load %arg6[%c0_12, %c0_13] : memref<32x32xf32, #tpu.memory_space<vmem>>, vector<32x32xf32>
    %cst_14 = arith.constant dense<0.000000e+00> : vector<16x32xf32>
    %16 = tpu.matmul %14, %15, %cst_14 {dimension_numbers = #tpu.dot_dimension_numbers<[1], [0], [0], [1], [0, 0, 1, 1], [], []>} : vector<16x32xf32>, vector<32x32xf32>, vector<16x32xf32> -> vector<16x32xf32>
    %c0_15 = arith.constant 0 : index
    %c0_16 = arith.constant 0 : index
    %17 = vector.load %arg7[%c0_15, %c0_16] : memref<1x32xf32, #tpu.memory_space<vmem>>, vector<1x32xf32>
    %18 = vector.broadcast %17 : vector<1x32xf32> to vector<16x32xf32>
    %19 = arith.addf %16, %18 : vector<16x32xf32>
    %cst_17 = arith.constant 0.000000e+00 : f32
    %20 = vector.broadcast %cst_17 : f32 to vector<16x32xf32>
    %21 = arith.maximumf %19, %20 : vector<16x32xf32>
    %c0_18 = arith.constant 0 : index
    %c0_19 = arith.constant 0 : index
    %22 = vector.load %arg8[%c0_18, %c0_19] : memref<32x128xf32, #tpu.memory_space<vmem>>, vector<32x128xf32>
    %cst_20 = arith.constant dense<0.000000e+00> : vector<16x128xf32>
    %23 = tpu.matmul %21, %22, %cst_20 {dimension_numbers = #tpu.dot_dimension_numbers<[1], [0], [0], [1], [0, 0, 1, 1], [], []>} : vector<16x32xf32>, vector<32x128xf32>, vector<16x128xf32> -> vector<16x128xf32>
    %c0_21 = arith.constant 0 : index
    %c0_22 = arith.constant 0 : index
    %24 = vector.load %arg9[%c0_21, %c0_22] : memref<1x128xf32, #tpu.memory_space<vmem>>, vector<1x128xf32>
    %25 = vector.broadcast %24 : vector<1x128xf32> to vector<16x128xf32>
    %26 = arith.addf %23, %25 : vector<16x128xf32>
    %cst_23 = arith.constant 0.000000e+00 : f32
    %27 = vector.broadcast %cst_23 : f32 to vector<16x128xf32>
    %28 = arith.maximumf %26, %27 : vector<16x128xf32>
    %c0_24 = arith.constant 0 : index
    %c0_25 = arith.constant 0 : index
    %29 = vector.load %arg10[%c0_24, %c0_25] : memref<1x128xf32, #tpu.memory_space<vmem>>, vector<1x128xf32>
    %30 = vector.broadcast %29 : vector<1x128xf32> to vector<16x128xf32>
    %31 = arith.mulf %30, %28 : vector<16x128xf32>
    %c0_26 = arith.constant 0 : index
    %c0_27 = arith.constant 0 : index
    %32 = vector.load %arg11[%c0_26, %c0_27] : memref<16x128xf32, #tpu.memory_space<vmem>>, vector<16x128xf32>
    tpu.vector_store %arg11[%c0_26, %c0_27], %31 {strides = array<i32>} : memref<16x128xf32, #tpu.memory_space<vmem>>, vector<16x128xf32>,
    return
  }
  func.func @transform_0(%arg0: i32) -> (i32, i32) {
    %c0_i32 = arith.constant 0 : i32
    %c0_i32_0 = arith.constant 0 : i32
    return %arg0, %c0_i32 : i32, i32
  }
  func.func @transform_1(%arg0: i32) -> (i32, i32) {
    %c0_i32 = arith.constant 0 : i32
    %c0_i32_0 = arith.constant 0 : i32
    %c0_i32_1 = arith.constant 0 : i32
    return %c0_i32, %c0_i32_0 : i32, i32
  }
  func.func @transform_2(%arg0: i32) -> (i32, i32) {
    %c0_i32 = arith.constant 0 : i32
    %c0_i32_0 = arith.constant 0 : i32
    %c0_i32_1 = arith.constant 0 : i32
    return %c0_i32, %c0_i32_0 : i32, i32
  }
  func.func @transform_3(%arg0: i32) -> (i32, i32) {
    %c0_i32 = arith.constant 0 : i32
    %c0_i32_0 = arith.constant 0 : i32
    %c0_i32_1 = arith.constant 0 : i32
    return %c0_i32, %c0_i32_0 : i32, i32
  }
  func.func @transform_4(%arg0: i32) -> (i32, i32) {
    %c0_i32 = arith.constant 0 : i32
    %c0_i32_0 = arith.constant 0 : i32
    %c0_i32_1 = arith.constant 0 : i32
    return %c0_i32, %c0_i32_0 : i32, i32
  }
  func.func @transform_5(%arg0: i32) -> (i32, i32) {
    %c0_i32 = arith.constant 0 : i32
    %c0_i32_0 = arith.constant 0 : i32
    %c0_i32_1 = arith.constant 0 : i32
    return %c0_i32, %c0_i32_0 : i32, i32
  }
  func.func @transform_6(%arg0: i32) -> (i32, i32) {
    %c0_i32 = arith.constant 0 : i32
    %c0_i32_0 = arith.constant 0 : i32
    %c0_i32_1 = arith.constant 0 : i32
    return %c0_i32, %c0_i32_0 : i32, i32
  }
  func.func @transform_7(%arg0: i32) -> (i32, i32) {
    %c0_i32 = arith.constant 0 : i32
    %c0_i32_0 = arith.constant 0 : i32
    %c0_i32_1 = arith.constant 0 : i32
    return %c0_i32, %c0_i32_0 : i32, i32
  }
  func.func @transform_8(%arg0: i32) -> (i32, i32) {
    %c0_i32 = arith.constant 0 : i32
    %c0_i32_0 = arith.constant 0 : i32
    %c0_i32_1 = arith.constant 0 : i32
    return %c0_i32, %c0_i32_0 : i32, i32
  }
  func.func @transform_9(%arg0: i32) -> (i32, i32) {
    %c0_i32 = arith.constant 0 : i32
    %c0_i32_0 = arith.constant 0 : i32
    %c0_i32_1 = arith.constant 0 : i32
    return %c0_i32, %c0_i32_0 : i32, i32
  }
  func.func @transform_10(%arg0: i32) -> (i32, i32) {
    %c0_i32 = arith.constant 0 : i32
    %c0_i32_0 = arith.constant 0 : i32
    return %arg0, %c0_i32 : i32, i32
  }
}

</mosaic_0001>

<bundles_post_ra>
// kernel: tpu_custom_call.1
= control target key start
LH: loop header
LB: loop body
LE: loop exit
PB: predicated region body
PF: predicated region fallthrough
CT: control target
= control target key end

     0   :  { %15 = vsyncpa [#allocation3], 0  ;;  %s817_s0 = inlined_call_operand.hbm [shape: f32[16,32], index: 0, kind: input, shape index: {}]   ;;  %s818_s1 = inlined_call_operand.vmem [shape: f32[32,64], index: 1, kind: input, shape index: {}]   ;;  %s819_s2 = inlined_call_operand.vmem [shape: f32[1,64], index: 2, kind: input, shape index: {}]   ;;  %s820_s3 = inlined_call_operand.vmem [shape: f32[64,32], index: 3, kind: input, shape index: {}]   ;;  %s821_s4 = inlined_call_operand.vmem [shape: f32[1,32], index: 4, kind: input, shape index: {}]   ;;  %s822_s5 = inlined_call_operand.vmem [shape: f32[32,32], index: 5, kind: input, shape index: {}]   ;;  %s823_s6 = inlined_call_operand.vmem [shape: f32[1,32], index: 6, kind: input, shape index: {}]   ;;  %s824_s7 = inlined_call_operand.vmem [shape: f32[32,128], index: 7, kind: input, shape index: {}]   ;;  %s825_s8 = inlined_call_operand.vmem [shape: f32[1,128], index: 8, kind: input, shape index: {}]   ;;  %s826_s9 = inlined_call_operand.vmem [shape: f32[1,128], index: 9, kind: input, shape index: {}]   ;;  %s827_s10 = inlined_call_operand.hbm [shape: f32[16,128], index: 10, kind: output, shape index: {}]  }
   0x1   :  { %16 = vsyncpa [#allocation4], 0  ;;  %s647_s13 = smov [#allocation2]   ;;  %s599_s17 = scalar_lea.hbm %s817_s0, 256 }
   0x2   :  { %s22_s14 = sshll.u32 %s647_s13, 4  ;;  %p600_p0 = scmp.ne.s32.totalorder %s817_s0, %s599_s17  ;;  %s23_s14 = int_to_ptr.vmem [resolvable:$true] %s22_s14 }
   0x3   :  { %p603_p1 = scmp.lt.u32.totalorder %s599_s17, %s817_s0 }
   0x5   :  { %p605_p2 = pnand %p603_p1, %p600_p0 }
   0x7   :  { %608 = shalt.err (!%p605_p2)
}
   0x8   :  { %s609_s22 = scalar_lea.vmem %s23_s14, 256  ;;  %p614_p4 = scmp.lt.s32.totalorder %s23_s14, %s23_s14 }
   0x9   :  { %p610_p3 = scmp.ne.s32.totalorder %s23_s14, %s609_s22  ;;  %p615_p5 = scmp.lt.s32.totalorder %s609_s22, %s609_s22 }
   0xb   :  { %p616_p6 = por %p615_p5, %p614_p4 }
   0xd   :  { %p617_p7 = pnand %p616_p6, %p610_p3 }
   0xf   :  { %620 = shalt.err (!%p617_p7)
}
  0x10   :  { %s648_s23 = smov 128   ;;  %s649_s24 = smov 8  }
  0x11   :  { %28 = dma.hbm_to_vmem [thread:$0]  %s817_s0, 256, %s23_s14, [#allocation3], %s648_s23, %s648_s23, %s649_s24  }
  0x12   :  { %643 = dma.done.wait [#allocation3], 256  }
  0x13   :  { %644 = vsyncadd [#allocation3], 4294967040  ;;  %vm63_vm0 = vcmask 261120   ;;  %v52_v0 = vld [vmem:[%s818_s1] sm:$0xff]  ;;  %v53_v1 = vld [vmem:[%s818_s1 + $0x8] sm:$0xff]  ;;  %vm162_vm1 = vcmask 523264  }
  0x14   :  { %v54_v2 = vld [vmem:[%s818_s1 + $0x10] sm:$0xff]  ;;  %v555_v3 = vpack.c.bf16 %v53_v1, %v52_v0  ;;  %v55_v4 = vld [vmem:[%s818_s1 + $0x18] sm:$0xff]  ;;  %v50_v5 = vld [vmem:[#allocation2] sm:$0xff] }
  0x15   :  { %v559_v6 = vpack.c.bf16 %v55_v4, %v54_v2  ;;  %511 = vmatprep.mubr.msk.f32.mxu0 %vm63_vm0, %v50_v5  ;;  %v147_v7 = vld [vmem:[%s820_s3] sm:$0xff]  ;;  %v148_v8 = vld [vmem:[%s820_s3 + $0x8] sm:$0xff]  ;;  %v149_v9 = vld [vmem:[%s820_s3 + $0x10] sm:$0xff] }
  0x16   :  { %556 = vmatprep.subr.bf16.mxu0 %v555_v3  ;;  %v563_v10 = vpack.c.bf16 %v148_v8, %v147_v7  ;;  %v150_v11 = vld [vmem:[%s820_s3 + $0x18] sm:$0xff]  ;;  %v151_v13 = vld [vmem:[%s820_s3 + $0x20] sm:$0xff]  ;;  %v152_v14 = vld [vmem:[%s820_s3 + $0x28] sm:$0xff] }
  0x17   :  { %558 = vmatpush3.bf16.msra.mxu0 %v555_v3  ;;  %v567_v12 = vpack.c.bf16 %v150_v11, %v149_v9  ;;  %v571_v15 = vpack.c.bf16 %v152_v14, %v151_v13  ;;  %v51_v16 = vld [vmem:[#allocation2 + $0x8] sm:$0xff]  ;;  %v153_v17 = vld [vmem:[%s820_s3 + $0x30] sm:$0xff]  ;;  %v154_v18 = vld [vmem:[%s820_s3 + $0x38] sm:$0xff] }
  0x18   :  { %560 = vmatprep.subr.bf16.mxu0 %v559_v6  ;;  %564 = vmatprep.subr.bf16.mxu1 %v563_v10  ;;  %v575_v19 = vpack.c.bf16 %v154_v18, %v153_v17  ;;  %v246_v20 = vld [vmem:[%s822_s5] sm:$0xff]  ;;  %v247_v21 = vld [vmem:[%s822_s5 + $0x8] sm:$0xff]  ;;  %v248_v30 = vld [vmem:[%s822_s5 + $0x10] sm:$0xff] }
  0x19   :  { %566 = vmatpush3.bf16.msra.mxu1 %v563_v10  ;;  %v579_v22 = vpack.c.bf16 %v247_v21, %v246_v20  ;;  %v462_v23 = vld [vmem:[%s819_s2] ss:$0 sm:$0xff]  ;;  %v249_v31 = vld [vmem:[%s822_s5 + $0x18] sm:$0xff]  ;;  %v341_v34 = vld [vmem:[%s824_s7 + $0x8] sm:$0xff] }
  0x1a   :  { %568 = vmatprep.subr.bf16.mxu1 %v567_v12  ;;  %v583_v32 = vpack.c.bf16 %v249_v31, %v248_v30  ;;  %v340_v33 = vld [vmem:[%s824_s7] sm:$0xff]  ;;  %v342_v43 = vld [vmem:[%s824_s7 + $0x10] sm:$0xff]  ;;  %v343_v44 = vld [vmem:[%s824_s7 + $0x18] sm:$0xff] }
  0x1b   :  { %562 = vmatpush3.bf16.msra.mxu0 %v559_v6  ;;  %v587_v35 = vpack.c.bf16 %v341_v34, %v340_v33  ;;  %v465_v36 = vld [vmem:[%s821_s4] ss:$0 sm:$0xff]  ;;  %v591_v45 = vpack.c.bf16 %v343_v44, %v342_v43 }
  0x1c   :  { %580 = vmatprep.subr.bf16.mxu0 %v579_v22  ;;  %v468_v46 = vld [vmem:[%s823_s6] ss:$0 sm:$0xff]  ;;  %s650_s6 = smov [#allocation5]  }
  0x1d   :  { %570 = vmatpush3.bf16.msra.mxu1 %v567_v12  ;;  %v471_v53 = vld [vmem:[%s825_s8] ss:$0 sm:$0xff]  ;;  %s450_s12 = sshll.u32 %s650_s6, 4  ;;  %s451_s12 = int_to_ptr.vmem [resolvable:$true] %s450_s12 }
  0x1e   :  { %512 = vmatmul.mubr.msk.f32.vlgmr.msra.gmra.mrb[0].mxu0 %vm63_vm0, %v51_v16  ;;  %572 = vmatprep.subr.bf16.mxu1 %v571_v15  ;;  %v474_v57 = vld [vmem:[%s826_s9] ss:$0 sm:$0xff]  ;;  %s621_s13 = scalar_lea.vmem %s451_s12, 256  ;;  %p626_p9 = scmp.lt.s32.totalorder %s451_s12, %s451_s12 }
  0x1f   :  { %582 = vmatpush3.bf16.msra.mxu0 %v579_v22  ;;  %p622_p8 = scmp.ne.s32.totalorder %s451_s12, %s621_s13  ;;  %p627_p10 = scmp.lt.s32.totalorder %s621_s13, %s621_s13 }
  0x20   :  { %584 = vmatprep.subr.bf16.mxu0 %v583_v32 }
  0x21   :  { %574 = vmatpush3.bf16.msra.mxu1 %v571_v15  ;;  %p628_p11 = por %p627_p10, %p626_p9 }
  0x22   :  { %576 = vmatprep.subr.bf16.mxu1 %v575_v19 }
  0x23   :  { %586 = vmatpush3.bf16.msra.mxu0 %v583_v32  ;;  %p629_p12 = pnand %p628_p11, %p622_p8 }
  0x24   :  { %588 = vmatprep.subr.bf16.mxu0 %v587_v35 }
  0x25   :  { %578 = vmatpush3.bf16.msra.mxu1 %v575_v19 }
  0xf1   :  { %v513_v24 = vpop.f32.mrb[0].mxu0 }
  0xf2   :  { %v142_v25 = vadd.f32 %v513_v24, %v462_v23  ;;  %v136_v26 = vpop.f32.mrb[1].mxu0 }
  0xf3   :  { %v137_v27 = vadd.f32 %v462_v23, %v136_v26 }
  0xf4   :  { %v146_v29 = vmax.f32 %v142_v25, 0.0 }
  0xf5   :  { %v145_v28 = vmax.f32 %v137_v27, 0.0 }
  0xf7   :  { %530 = vmatprep.mubr.msk.f32.mxu1 %vm162_vm1, %v145_v28 }
  0xf8   :  { %531 = vmatmul.mubr.msk.f32.vlgmr.msra.gmra.mrb[0].mxu1 %vm162_vm1, %v146_v29 }
 0x1cb   :  { %v532_v37 = vpop.f32.mrb[0].mxu1 }
 0x1cc   :  { %v241_v38 = vadd.f32 %v532_v37, %v465_v36  ;;  %v235_v39 = vpop.f32.mrb[1].mxu1 }
 0x1cd   :  { %v236_v40 = vadd.f32 %v465_v36, %v235_v39 }
 0x1ce   :  { %v245_v42 = vmax.f32 %v241_v38, 0.0 }
 0x1cf   :  { %v244_v41 = vmax.f32 %v236_v40, 0.0 }
 0x1d1   :  { %541 = vmatprep.mubr.msk.f32.mxu0 %vm63_vm0, %v244_v41 }
 0x1d2   :  { %542 = vmatmul.mubr.msk.f32.vlgmr.msra.gmra.mrb[2].mxu0 %vm63_vm0, %v245_v42 }
 0x1d3   :  { %590 = vmatpush3.bf16.msra.mxu0 %v587_v35 }
 0x1d4   :  { %592 = vmatprep.subr.bf16.mxu0 %v591_v45 }
 0x1d7   :  { %594 = vmatpush3.bf16.msra.mxu0 %v591_v45 }
 0x2a5   :  { %v543_v47 = vpop.f32.mrb[2].mxu0 }
 0x2a6   :  { %v335_v48 = vadd.f32 %v543_v47, %v468_v46  ;;  %v329_v49 = vpop.f32.mrb[3].mxu0 }
 0x2a7   :  { %v330_v50 = vadd.f32 %v468_v46, %v329_v49 }
 0x2a8   :  { %v339_v52 = vmax.f32 %v335_v48, 0.0 }
 0x2a9   :  { %v338_v51 = vmax.f32 %v330_v50, 0.0 }
 0x2ab   :  { %552 = vmatprep.mubr.msk.f32.mxu0 %vm63_vm0, %v338_v51 }
 0x2ac   :  { %553 = vmatmul.mubr.msk.f32.vlgmr.msra.gmra.mrb[4].mxu0 %vm63_vm0, %v339_v52 }
 0x37f   :  { %v554_v54 = vpop.f32.mrb[4].mxu0 }
 0x380   :  { %v429_v55 = vadd.f32 %v554_v54, %v471_v53  ;;  %v423_v56 = vpop.f32.mrb[5].mxu0 }
 0x381   :  { %v424_v58 = vadd.f32 %v471_v53, %v423_v56 }
 0x382   :  { %v433_v59 = vmax.f32 %v429_v55, 0.0 }
 0x383   :  { %v432_v60 = vmax.f32 %v424_v58, 0.0 }
 0x384   :  { %v442_v61 = vmul.f32 %v474_v57, %v433_v59 }
 0x385   :  { %v441_v62 = vmul.f32 %v474_v57, %v432_v60 }
 0x386   :  { %444 = vst [vmem:[#allocation5 + $0x8] sm:$0xff] %v442_v61 }
 0x387   :  { %443 = vst [vmem:[#allocation5] sm:$0xff] %v441_v62 }
 0x388   :  { %632 = shalt.err (!%p629_p12)
}
 0x389   :  { %s633_s9 = scalar_lea.hbm %s827_s10, 256 }
 0x38a   :  { %p634_p13 = scmp.ne.s32.totalorder %s827_s10, %s633_s9  ;;  %p637_p0 = scmp.lt.u32.totalorder %s633_s9, %s827_s10 }
 0x38c   :  { %p639_p1 = pnand %p637_p0, %p634_p13 }
 0x38e   :  { %642 = shalt.err (!%p639_p1)
}
 0x38f   :  { %456 = dma.vmem_to_hbm [thread:$0]  %s451_s12, 256, %s827_s10, [#allocation4], %s648_s23, %s648_s23, %s649_s24  }
 0x390   :  { %645 = dma.done.wait [#allocation4], 256  }
 0x391   :  { %646 = vsyncadd [#allocation4], 4294967040 }
 0x392   :  { %460 = vsyncpa [#allocation3], 1 }
 0x393   :  { %461 = vsyncpa [#allocation4], 1 }

</bundles_post_ra>
